<compile_context>
chip_gen: v7x
topology: tpu7x:2x2x1
jax: 0.10.0
libtpu: 0.0.40
codegen_flags: <defaults>
</compile_context>

<pallas_src>
import jax
import jax.numpy as jnp
from jax import lax
from jax.experimental import pallas as pl
from jax.experimental.pallas import tpu as pltpu

# ----------------------------- sizes (small) ---------------------------------
VOCAB = 20          # word vectors (a zero row is prepended for padding_idx=0)
EMB   = 32          # word-vector dim
SEQ   = 8           # max_seq
HID   = 32          # num_hidden
KEY   = 5           # num_key_ingre
BATCH = 2
LANES = 128         # lane width of the packed weight / output slabs


def _r8(n):
    return -(-n // 8) * 8


# ---- row layout of the packed weight slab (all sections 8-row aligned) ------
V_ROWS    = VOCAB + 1                       # 21 embedding rows (incl. zero row)
ROW_TABLE = 0
ROW_WIH   = ROW_TABLE + _r8(V_ROWS)         # 24   (E, 3H)
ROW_WHH   = ROW_WIH + _r8(EMB)              # 56   (H, 3H)
ROW_BIH   = ROW_WHH + _r8(HID)              # 88   (1, 3H)
ROW_BHH   = ROW_BIH + 8                     # 96   (1, 3H)
ROW_W1    = ROW_BHH + 8                     # 104  (H, H)
ROW_B1    = ROW_W1 + _r8(HID)               # 136  (1, H)
ROW_W2    = ROW_B1 + 8                      # 144  (H, K) zero-padded to 32 cols
ROW_B2    = ROW_W2 + _r8(HID)               # 176  (1, K) zero-padded
ROW_W3    = ROW_B2 + 8                      # 184  (1, K) zero-padded
ROW_B3    = ROW_W3 + 1                      # 185  scalar at col 0
N_WROWS   = ROW_W3 + 8                      # 192

V_PAD = ROW_WIH - ROW_TABLE                 # 24  one-hot width (pad rows are 0)
K_PAD = 32                                  # attention scores padded to 32 lanes

OUT_ROWS = SEQ * BATCH + BATCH              # 18: 16 per-(s,b) rows + 2 att rows


# ------------------------- fused encoder kernel -------------------------------
def encoder_kernel(yidx_ref, w_ref, out_ref):
    B, S, E, H, K = BATCH, SEQ, EMB, HID, KEY
    SB = S * B
    f32 = jnp.float32

    # ---- (1) embedding gather as one one-hot MXU matmul ----------------------
    ids = yidx_ref[...]                                        # (SB, 1) int32
    iota = lax.broadcasted_iota(jnp.int32, (SB, V_PAD), 1)
    one_hot = (ids == iota).astype(f32)                        # (SB, V_PAD)
    table = w_ref[ROW_TABLE:ROW_TABLE + V_PAD, 0:E]            # pad rows are 0
    embed = jnp.dot(one_hot, table, preferred_element_type=f32)  # (SB, E)

    # ---- (2) hoisted input->hidden projection for the whole sequence ---------
    wih = w_ref[ROW_WIH:ROW_WIH + E, 0:3 * H]
    bih = w_ref[ROW_BIH:ROW_BIH + 1, 0:3 * H]
    gi_all = jnp.dot(embed, wih, preferred_element_type=f32) + bih   # (SB, 3H)

    # ---- (3) GRU recurrence, state fully register-resident -------------------
    whh = w_ref[ROW_WHH:ROW_WHH + H, 0:3 * H]
    bhh = w_ref[ROW_BHH:ROW_BHH + 1, 0:3 * H]
    h = jnp.zeros((B, H), f32)
    hs = []
    for t in range(S):                      # S tiny & static -> fully unrolled
        gi = gi_all[t * B:(t + 1) * B, :]                      # (B, 3H)
        gh = jnp.dot(h, whh, preferred_element_type=f32) + bhh
        # r and z gates share one fused sigmoid push
        rz = jax.nn.sigmoid(gi[:, 0:2 * H] + gh[:, 0:2 * H])
        r = rz[:, 0:H]
        z = rz[:, H:2 * H]
        n = jnp.tanh(gi[:, 2 * H:3 * H] + r * gh[:, 2 * H:3 * H])
        h = (1.0 - z) * n + z * h
        hs.append(h)
    y_all = jnp.concatenate(hs, axis=0)                        # (SB, H), seq-major

    # ---- (4) attention pooling over all (s, b) positions at once -------------
    w1 = w_ref[ROW_W1:ROW_W1 + H, 0:H]
    b1 = w_ref[ROW_B1:ROW_B1 + 1, 0:H]
    w2 = w_ref[ROW_W2:ROW_W2 + H, 0:K_PAD]     # cols >= K are exactly zero
    b2 = w_ref[ROW_B2:ROW_B2 + 1, 0:K_PAD]
    w3 = w_ref[ROW_W3:ROW_W3 + 1, 0:K_PAD]
    b3 = w_ref[ROW_B3:ROW_B3 + 1, 0:1]

    a1 = jnp.tanh(jnp.dot(y_all, w1, preferred_element_type=f32) + b1)
    att = jnp.dot(a1, w2, preferred_element_type=f32) + b2     # (SB, K_PAD)

    # out[b] = sum_s (att[s,b,:K] . w3) * y[s,b,:] + b3  (no (K,H) intermediate)
    sw = jnp.sum(att * w3, axis=1, keepdims=True)              # (SB, 1)
    weighted = sw * y_all                                      # (SB, H)
    acc = weighted[0:B, :]
    for t in range(1, S):
        acc = acc + weighted[t * B:(t + 1) * B, :]
    att_out = acc + b3                                         # (B, H)

    # ---- (5) single lane-dense output slab: one unmasked store, one DMA ------
    tail = jnp.zeros((SB, LANES - (H + E + K_PAD)), f32)       # (SB, 32)
    sb_block = jnp.concatenate([y_all, embed, att, tail], axis=1)       # (SB,128)
    att_rows = jnp.concatenate([att_out, jnp.zeros((B, LANES - H), f32)],
                               axis=1)                                  # (B, 128)
    out_ref[...] = jnp.concatenate([sb_block, att_rows], axis=0)        # (SB+B,128)


# ------------------------- wrapper-side param packing --------------------------
def pack_encoder_params(params):
    """Pack all weights/biases into one (N_WROWS, 128) f32 slab (done once)."""
    H, E, K = HID, EMB, KEY
    slab = jnp.zeros((N_WROWS, LANES), jnp.float32)
    slab = slab.at[ROW_TABLE:ROW_TABLE + V_ROWS, :E].set(params["embedding"])
    slab = slab.at[ROW_WIH:ROW_WIH + E, :3 * H].set(params["w_ih"].T)
    slab = slab.at[ROW_WHH:ROW_WHH + H, :3 * H].set(params["w_hh"].T)
    slab = slab.at[ROW_BIH, :3 * H].set(params["b_ih"])
    slab = slab.at[ROW_BHH, :3 * H].set(params["b_hh"])
    slab = slab.at[ROW_W1:ROW_W1 + H, :H].set(params["ws1_w"].T)
    slab = slab.at[ROW_B1, :H].set(params["ws1_b"])
    slab = slab.at[ROW_W2:ROW_W2 + H, :K].set(params["ws2_w"].T)
    slab = slab.at[ROW_B2, :K].set(params["ws2_b"])
    slab = slab.at[ROW_W3, :K].set(params["ingre2att_w"][0])
    slab = slab.at[ROW_B3, 0].set(params["ingre2att_b"][0])
    return slab


# ------------------------------ full forward ----------------------------------
@jax.jit
def encoder_t_forward(y, w_slab):
    B, S = y.shape
    E, H, K = EMB, HID, KEY
    SB = S * B

    # tiny index-only plumbing (fused under jit): (B, S) -> seq-major (S*B, 1)
    y_ids = jnp.transpose(y).reshape(SB, 1).astype(jnp.int32)

    vmem = pl.BlockSpec(memory_space=pltpu.MemorySpace.VMEM)
    out = pl.pallas_call(
        encoder_kernel,
        out_shape=jax.ShapeDtypeStruct((OUT_ROWS, LANES), jnp.float32),
        in_specs=[vmem, vmem],
        out_specs=vmem,
    )(y_ids, w_slab)

    # metadata-only slices / reshapes inside the same jit
    y_flat    = out[0:SB, 0:H]                                   # (S*B, H)
    emb_flat  = out[0:SB, H:H + E]                               # (S*B, E)
    multi     = out[0:SB, H + E:H + E + K]                       # (S*B, K)
    att_out   = out[SB:SB + B, 0:H]                              # (B, H)

    multi_attention = jnp.transpose(multi.reshape(S, B, K), (1, 0, 2))  # (B,S,K)
    y_embeds = y_flat.reshape(S, B, H)                                  # (S,B,H)
    embed_vector = emb_flat.reshape(S, B, E)                            # (S,B,E)
    return att_out, multi_attention, y_embeds, embed_vector


# ------------------------------ pure-JAX ref -----------------------------------
def encoder_t_reference(y, params):
    embed_bm = params["embedding"][y]
    x = jnp.transpose(embed_bm, (1, 0, 2))
    B = y.shape[0]
    H = HID
    h0 = jnp.zeros((B, H), jnp.float32)

    def step(h, x_t):
        gi = x_t @ params["w_ih"].T + params["b_ih"]
        gh = h @ params["w_hh"].T + params["b_hh"]
        r = jax.nn.sigmoid(gi[:, :H] + gh[:, :H])
        z = jax.nn.sigmoid(gi[:, H:2 * H] + gh[:, H:2 * H])
        n = jnp.tanh(gi[:, 2 * H:] + r * gh[:, 2 * H:])
        h_new = (1.0 - z) * n + z * h
        return h_new, h_new

    _, y_embeds = lax.scan(step, h0, x)                     # (S, B, H)
    yb = jnp.transpose(y_embeds, (1, 0, 2))                 # (B, S, H)
    a1 = jnp.tanh(yb @ params["ws1_w"].T + params["ws1_b"])
    att = a1 @ params["ws2_w"].T + params["ws2_b"]          # (B, S, K)
    att_t = jnp.transpose(att, (0, 2, 1))                   # (B, K, S)
    ay = jnp.einsum("bks,bsh->bkh", att_t, yb)              # (B, K, H)
    out = jnp.einsum("bkh,k->bh", ay, params["ingre2att_w"][0]) + params["ingre2att_b"][0]
    return out, att, y_embeds, x


# ---------------------------------- main ---------------------------------------
if __name__ == "__main__":
    key = jax.random.PRNGKey(0)
    ks = jax.random.split(key, 12)

    word_vec = jax.random.normal(ks[0], (VOCAB, EMB), jnp.float32) * 0.1
    embedding = jnp.concatenate([jnp.zeros((1, EMB), jnp.float32), word_vec], 0)

    params = {
        "embedding": embedding,
        "w_ih": jax.random.normal(ks[1], (3 * HID, EMB), jnp.float32) * 0.05,
        "w_hh": jax.random.normal(ks[2], (3 * HID, HID), jnp.float32) * 0.05,
        "b_ih": jax.random.normal(ks[3], (3 * HID,), jnp.float32) * 0.05,
        "b_hh": jax.random.normal(ks[4], (3 * HID,), jnp.float32) * 0.05,
        "ws1_w": jax.random.normal(ks[5], (HID, HID), jnp.float32) * 0.01,
        "ws1_b": jax.random.normal(ks[6], (HID,), jnp.float32) * 0.01,
        "ws2_w": jax.random.normal(ks[7], (KEY, HID), jnp.float32) * 0.01,
        "ws2_b": jax.random.normal(ks[8], (KEY,), jnp.float32) * 0.01,
        "ingre2att_w": jax.random.normal(ks[9], (1, KEY), jnp.float32) * 0.01,
        "ingre2att_b": jax.random.normal(ks[10], (1,), jnp.float32) * 0.01,
    }

    y_tokens = jax.random.randint(ks[11], (BATCH, SEQ), 0, VOCAB + 1, dtype=jnp.int32)

    w_slab = jax.block_until_ready(pack_encoder_params(params))   # packed once

    outs = jax.block_until_ready(encoder_t_forward(y_tokens, w_slab))
    att_y_embeds, multi_attention, y_embeds, embed_vector = outs

    refs = jax.block_until_ready(encoder_t_reference(y_tokens, params))
    for o, r in zip(outs, refs):
        assert o.shape == r.shape, (o.shape, r.shape)
        assert jnp.allclose(o, r, rtol=1e-4, atol=1e-4), "mismatch vs reference"

    assert att_y_embeds.shape == (BATCH, HID)
    assert multi_attention.shape == (BATCH, SEQ, KEY)
    assert y_embeds.shape == (SEQ, BATCH, HID)
    assert embed_vector.shape == (SEQ, BATCH, EMB)

    # TODO(synk): the ResNet conv trunk (conv1/bn/maxpool/layer1-4/avgpool) of
    # the source file is standard dense conv work handled by XLA, not this kernel.
    print("KERNEL_OK")
</pallas_src>

<mosaic_0001>
module attributes {stable_mosaic.version = 11 : i64} {
  func.func @encoder_kernel(%arg0: memref<16x1xi32, #tpu.memory_space<vmem>>, %arg1: memref<192x128xf32, #tpu.memory_space<vmem>>, %arg2: memref<18x128xf32, #tpu.memory_space<vmem>>) attributes {dimension_semantics = [], scalar_prefetch = 0 : i64, scratch_operands = 0 : i64, tpu.core_type = #tpu.core_type<tc>} {
    %c0 = arith.constant 0 : index
    %c0_0 = arith.constant 0 : index
    %0 = vector.load %arg0[%c0, %c0_0] : memref<16x1xi32, #tpu.memory_space<vmem>>, vector<16x1xi32>
    %1 = tpu.iota {dimensions = array<i32: 1>} : vector<16x24xi32>
    %2 = vector.broadcast %0 : vector<16x1xi32> to vector<16x24xi32>
    %3 = arith.cmpi eq, %2, %1 : vector<16x24xi32>
    %4 = arith.extui %3 : vector<16x24xi1> to vector<16x24xi32>
    %5 = arith.sitofp %4 : vector<16x24xi32> to vector<16x24xf32>
    %c0_1 = arith.constant 0 : index
    %c0_2 = arith.constant 0 : index
    %6 = vector.load %arg1[%c0_1, %c0_2] : memref<192x128xf32, #tpu.memory_space<vmem>>, vector<24x32xf32>
    %cst = arith.constant dense<0.000000e+00> : vector<16x32xf32>
    %7 = tpu.matmul %5, %6, %cst {dimension_numbers = #tpu.dot_dimension_numbers<[1], [0], [0], [1], [0, 0, 1, 1], [], []>} : vector<16x24xf32>, vector<24x32xf32>, vector<16x32xf32> -> vector<16x32xf32>
    %c24 = arith.constant 24 : index
    %c0_3 = arith.constant 0 : index
    %8 = vector.load %arg1[%c24, %c0_3] : memref<192x128xf32, #tpu.memory_space<vmem>>, vector<32x96xf32>
    %c88 = arith.constant 88 : index
    %c0_4 = arith.constant 0 : index
    %9 = vector.load %arg1[%c88, %c0_4] : memref<192x128xf32, #tpu.memory_space<vmem>>, vector<1x96xf32>
    %cst_5 = arith.constant dense<0.000000e+00> : vector<16x96xf32>
    %10 = tpu.matmul %7, %8, %cst_5 {dimension_numbers = #tpu.dot_dimension_numbers<[1], [0], [0], [1], [0, 0, 1, 1], [], []>} : vector<16x32xf32>, vector<32x96xf32>, vector<16x96xf32> -> vector<16x96xf32>
    %11 = vector.broadcast %9 : vector<1x96xf32> to vector<16x96xf32>
    %12 = arith.addf %10, %11 : vector<16x96xf32>
    %c56 = arith.constant 56 : index
    %c0_6 = arith.constant 0 : index
    %13 = vector.load %arg1[%c56, %c0_6] : memref<192x128xf32, #tpu.memory_space<vmem>>, vector<32x96xf32>
    %c96 = arith.constant 96 : index
    %c0_7 = arith.constant 0 : index
    %14 = vector.load %arg1[%c96, %c0_7] : memref<192x128xf32, #tpu.memory_space<vmem>>, vector<1x96xf32>
    %cst_8 = arith.constant 0.000000e+00 : f32
    %15 = vector.broadcast %cst_8 : f32 to vector<2x32xf32>
    %16 = vector.extract_strided_slice %12 {offsets = [0, 0], sizes = [2, 96], strides = [1, 1]} : vector<16x96xf32> to vector<2x96xf32>
    %cst_9 = arith.constant dense<0.000000e+00> : vector<2x96xf32>
    %17 = tpu.matmul %15, %13, %cst_9 {dimension_numbers = #tpu.dot_dimension_numbers<[1], [0], [0], [1], [0, 0, 1, 1], [], []>} : vector<2x32xf32>, vector<32x96xf32>, vector<2x96xf32> -> vector<2x96xf32>
    %18 = vector.broadcast %14 : vector<1x96xf32> to vector<2x96xf32>
    %19 = arith.addf %17, %18 : vector<2x96xf32>
    %20 = vector.extract_strided_slice %16 {offsets = [0, 0], sizes = [2, 64], strides = [1, 1]} : vector<2x96xf32> to vector<2x64xf32>
    %21 = vector.extract_strided_slice %19 {offsets = [0, 0], sizes = [2, 64], strides = [1, 1]} : vector<2x96xf32> to vector<2x64xf32>
    %22 = arith.addf %20, %21 : vector<2x64xf32>
    %23 = arith.negf %22 : vector<2x64xf32>
    %24 = math.exp %23 : vector<2x64xf32>
    %cst_10 = arith.constant 1.000000e+00 : f32
    %25 = vector.broadcast %cst_10 : f32 to vector<2x64xf32>
    %26 = arith.addf %25, %24 : vector<2x64xf32>
    %27 = arith.divf %25, %26 : vector<2x64xf32>
    %28 = vector.extract_strided_slice %27 {offsets = [0, 0], sizes = [2, 32], strides = [1, 1]} : vector<2x64xf32> to vector<2x32xf32>
    %29 = vector.extract_strided_slice %27 {offsets = [0, 32], sizes = [2, 32], strides = [1, 1]} : vector<2x64xf32> to vector<2x32xf32>
    %30 = vector.extract_strided_slice %16 {offsets = [0, 64], sizes = [2, 32], strides = [1, 1]} : vector<2x96xf32> to vector<2x32xf32>
    %31 = vector.extract_strided_slice %19 {offsets = [0, 64], sizes = [2, 32], strides = [1, 1]} : vector<2x96xf32> to vector<2x32xf32>
    %32 = arith.mulf %28, %31 : vector<2x32xf32>
    %33 = arith.addf %30, %32 : vector<2x32xf32>
    %34 = math.tanh %33 : vector<2x32xf32>
    %cst_11 = arith.constant 1.000000e+00 : f32
    %35 = vector.broadcast %cst_11 : f32 to vector<2x32xf32>
    %36 = arith.subf %35, %29 : vector<2x32xf32>
    %37 = arith.mulf %36, %34 : vector<2x32xf32>
    %38 = arith.mulf %29, %15 : vector<2x32xf32>
    %39 = arith.addf %37, %38 : vector<2x32xf32>
    %40 = vector.extract_strided_slice %12 {offsets = [2, 0], sizes = [2, 96], strides = [1, 1]} : vector<16x96xf32> to vector<2x96xf32>
    %cst_12 = arith.constant dense<0.000000e+00> : vector<2x96xf32>
    %41 = tpu.matmul %39, %13, %cst_12 {dimension_numbers = #tpu.dot_dimension_numbers<[1], [0], [0], [1], [0, 0, 1, 1], [], []>} : vector<2x32xf32>, vector<32x96xf32>, vector<2x96xf32> -> vector<2x96xf32>
    %42 = vector.broadcast %14 : vector<1x96xf32> to vector<2x96xf32>
    %43 = arith.addf %41, %42 : vector<2x96xf32>
    %44 = vector.extract_strided_slice %40 {offsets = [0, 0], sizes = [2, 64], strides = [1, 1]} : vector<2x96xf32> to vector<2x64xf32>
    %45 = vector.extract_strided_slice %43 {offsets = [0, 0], sizes = [2, 64], strides = [1, 1]} : vector<2x96xf32> to vector<2x64xf32>
    %46 = arith.addf %44, %45 : vector<2x64xf32>
    %47 = arith.negf %46 : vector<2x64xf32>
    %48 = math.exp %47 : vector<2x64xf32>
    %cst_13 = arith.constant 1.000000e+00 : f32
    %49 = vector.broadcast %cst_13 : f32 to vector<2x64xf32>
    %50 = arith.addf %49, %48 : vector<2x64xf32>
    %51 = arith.divf %49, %50 : vector<2x64xf32>
    %52 = vector.extract_strided_slice %51 {offsets = [0, 0], sizes = [2, 32], strides = [1, 1]} : vector<2x64xf32> to vector<2x32xf32>
    %53 = vector.extract_strided_slice %51 {offsets = [0, 32], sizes = [2, 32], strides = [1, 1]} : vector<2x64xf32> to vector<2x32xf32>
    %54 = vector.extract_strided_slice %40 {offsets = [0, 64], sizes = [2, 32], strides = [1, 1]} : vector<2x96xf32> to vector<2x32xf32>
    %55 = vector.extract_strided_slice %43 {offsets = [0, 64], sizes = [2, 32], strides = [1, 1]} : vector<2x96xf32> to vector<2x32xf32>
    %56 = arith.mulf %52, %55 : vector<2x32xf32>
    %57 = arith.addf %54, %56 : vector<2x32xf32>
    %58 = math.tanh %57 : vector<2x32xf32>
    %cst_14 = arith.constant 1.000000e+00 : f32
    %59 = vector.broadcast %cst_14 : f32 to vector<2x32xf32>
    %60 = arith.subf %59, %53 : vector<2x32xf32>
    %61 = arith.mulf %60, %58 : vector<2x32xf32>
    %62 = arith.mulf %53, %39 : vector<2x32xf32>
    %63 = arith.addf %61, %62 : vector<2x32xf32>
    %64 = vector.extract_strided_slice %12 {offsets = [4, 0], sizes = [2, 96], strides = [1, 1]} : vector<16x96xf32> to vector<2x96xf32>
    %cst_15 = arith.constant dense<0.000000e+00> : vector<2x96xf32>
    %65 = tpu.matmul %63, %13, %cst_15 {dimension_numbers = #tpu.dot_dimension_numbers<[1], [0], [0], [1], [0, 0, 1, 1], [], []>} : vector<2x32xf32>, vector<32x96xf32>, vector<2x96xf32> -> vector<2x96xf32>
    %66 = vector.broadcast %14 : vector<1x96xf32> to vector<2x96xf32>
    %67 = arith.addf %65, %66 : vector<2x96xf32>
    %68 = vector.extract_strided_slice %64 {offsets = [0, 0], sizes = [2, 64], strides = [1, 1]} : vector<2x96xf32> to vector<2x64xf32>
    %69 = vector.extract_strided_slice %67 {offsets = [0, 0], sizes = [2, 64], strides = [1, 1]} : vector<2x96xf32> to vector<2x64xf32>
    %70 = arith.addf %68, %69 : vector<2x64xf32>
    %71 = arith.negf %70 : vector<2x64xf32>
    %72 = math.exp %71 : vector<2x64xf32>
    %cst_16 = arith.constant 1.000000e+00 : f32
    %73 = vector.broadcast %cst_16 : f32 to vector<2x64xf32>
    %74 = arith.addf %73, %72 : vector<2x64xf32>
    %75 = arith.divf %73, %74 : vector<2x64xf32>
    %76 = vector.extract_strided_slice %75 {offsets = [0, 0], sizes = [2, 32], strides = [1, 1]} : vector<2x64xf32> to vector<2x32xf32>
    %77 = vector.extract_strided_slice %75 {offsets = [0, 32], sizes = [2, 32], strides = [1, 1]} : vector<2x64xf32> to vector<2x32xf32>
    %78 = vector.extract_strided_slice %64 {offsets = [0, 64], sizes = [2, 32], strides = [1, 1]} : vector<2x96xf32> to vector<2x32xf32>
    %79 = vector.extract_strided_slice %67 {offsets = [0, 64], sizes = [2, 32], strides = [1, 1]} : vector<2x96xf32> to vector<2x32xf32>
    %80 = arith.mulf %76, %79 : vector<2x32xf32>
    %81 = arith.addf %78, %80 : vector<2x32xf32>
    %82 = math.tanh %81 : vector<2x32xf32>
    %cst_17 = arith.constant 1.000000e+00 : f32
    %83 = vector.broadcast %cst_17 : f32 to vector<2x32xf32>
    %84 = arith.subf %83, %77 : vector<2x32xf32>
    %85 = arith.mulf %84, %82 : vector<2x32xf32>
    %86 = arith.mulf %77, %63 : vector<2x32xf32>
    %87 = arith.addf %85, %86 : vector<2x32xf32>
    %88 = vector.extract_strided_slice %12 {offsets = [6, 0], sizes = [2, 96], strides = [1, 1]} : vector<16x96xf32> to vector<2x96xf32>
    %cst_18 = arith.constant dense<0.000000e+00> : vector<2x96xf32>
    %89 = tpu.matmul %87, %13, %cst_18 {dimension_numbers = #tpu.dot_dimension_numbers<[1], [0], [0], [1], [0, 0, 1, 1], [], []>} : vector<2x32xf32>, vector<32x96xf32>, vector<2x96xf32> -> vector<2x96xf32>
    %90 = vector.broadcast %14 : vector<1x96xf32> to vector<2x96xf32>
    %91 = arith.addf %89, %90 : vector<2x96xf32>
    %92 = vector.extract_strided_slice %88 {offsets = [0, 0], sizes = [2, 64], strides = [1, 1]} : vector<2x96xf32> to vector<2x64xf32>
    %93 = vector.extract_strided_slice %91 {offsets = [0, 0], sizes = [2, 64], strides = [1, 1]} : vector<2x96xf32> to vector<2x64xf32>
    %94 = arith.addf %92, %93 : vector<2x64xf32>
    %95 = arith.negf %94 : vector<2x64xf32>
    %96 = math.exp %95 : vector<2x64xf32>
    %cst_19 = arith.constant 1.000000e+00 : f32
    %97 = vector.broadcast %cst_19 : f32 to vector<2x64xf32>
    %98 = arith.addf %97, %96 : vector<2x64xf32>
    %99 = arith.divf %97, %98 : vector<2x64xf32>
    %100 = vector.extract_strided_slice %99 {offsets = [0, 0], sizes = [2, 32], strides = [1, 1]} : vector<2x64xf32> to vector<2x32xf32>
    %101 = vector.extract_strided_slice %99 {offsets = [0, 32], sizes = [2, 32], strides = [1, 1]} : vector<2x64xf32> to vector<2x32xf32>
    %102 = vector.extract_strided_slice %88 {offsets = [0, 64], sizes = [2, 32], strides = [1, 1]} : vector<2x96xf32> to vector<2x32xf32>
    %103 = vector.extract_strided_slice %91 {offsets = [0, 64], sizes = [2, 32], strides = [1, 1]} : vector<2x96xf32> to vector<2x32xf32>
    %104 = arith.mulf %100, %103 : vector<2x32xf32>
    %105 = arith.addf %102, %104 : vector<2x32xf32>
    %106 = math.tanh %105 : vector<2x32xf32>
    %cst_20 = arith.constant 1.000000e+00 : f32
    %107 = vector.broadcast %cst_20 : f32 to vector<2x32xf32>
    %108 = arith.subf %107, %101 : vector<2x32xf32>
    %109 = arith.mulf %108, %106 : vector<2x32xf32>
    %110 = arith.mulf %101, %87 : vector<2x32xf32>
    %111 = arith.addf %109, %110 : vector<2x32xf32>
    %112 = vector.extract_strided_slice %12 {offsets = [8, 0], sizes = [2, 96], strides = [1, 1]} : vector<16x96xf32> to vector<2x96xf32>
    %cst_21 = arith.constant dense<0.000000e+00> : vector<2x96xf32>
    %113 = tpu.matmul %111, %13, %cst_21 {dimension_numbers = #tpu.dot_dimension_numbers<[1], [0], [0], [1], [0, 0, 1, 1], [], []>} : vector<2x32xf32>, vector<32x96xf32>, vector<2x96xf32> -> vector<2x96xf32>
    %114 = vector.broadcast %14 : vector<1x96xf32> to vector<2x96xf32>
    %115 = arith.addf %113, %114 : vector<2x96xf32>
    %116 = vector.extract_strided_slice %112 {offsets = [0, 0], sizes = [2, 64], strides = [1, 1]} : vector<2x96xf32> to vector<2x64xf32>
    %117 = vector.extract_strided_slice %115 {offsets = [0, 0], sizes = [2, 64], strides = [1, 1]} : vector<2x96xf32> to vector<2x64xf32>
    %118 = arith.addf %116, %117 : vector<2x64xf32>
    %119 = arith.negf %118 : vector<2x64xf32>
    %120 = math.exp %119 : vector<2x64xf32>
    %cst_22 = arith.constant 1.000000e+00 : f32
    %121 = vector.broadcast %cst_22 : f32 to vector<2x64xf32>
    %122 = arith.addf %121, %120 : vector<2x64xf32>
    %123 = arith.divf %121, %122 : vector<2x64xf32>
    %124 = vector.extract_strided_slice %123 {offsets = [0, 0], sizes = [2, 32], strides = [1, 1]} : vector<2x64xf32> to vector<2x32xf32>
    %125 = vector.extract_strided_slice %123 {offsets = [0, 32], sizes = [2, 32], strides = [1, 1]} : vector<2x64xf32> to vector<2x32xf32>
    %126 = vector.extract_strided_slice %112 {offsets = [0, 64], sizes = [2, 32], strides = [1, 1]} : vector<2x96xf32> to vector<2x32xf32>
    %127 = vector.extract_strided_slice %115 {offsets = [0, 64], sizes = [2, 32], strides = [1, 1]} : vector<2x96xf32> to vector<2x32xf32>
    %128 = arith.mulf %124, %127 : vector<2x32xf32>
    %129 = arith.addf %126, %128 : vector<2x32xf32>
    %130 = math.tanh %129 : vector<2x32xf32>
    %cst_23 = arith.constant 1.000000e+00 : f32
    %131 = vector.broadcast %cst_23 : f32 to vector<2x32xf32>
    %132 = arith.subf %131, %125 : vector<2x32xf32>
    %133 = arith.mulf %132, %130 : vector<2x32xf32>
    %134 = arith.mulf %125, %111 : vector<2x32xf32>
    %135 = arith.addf %133, %134 : vector<2x32xf32>
    %136 = vector.extract_strided_slice %12 {offsets = [10, 0], sizes = [2, 96], strides = [1, 1]} : vector<16x96xf32> to vector<2x96xf32>
    %cst_24 = arith.constant dense<0.000000e+00> : vector<2x96xf32>
    %137 = tpu.matmul %135, %13, %cst_24 {dimension_numbers = #tpu.dot_dimension_numbers<[1], [0], [0], [1], [0, 0, 1, 1], [], []>} : vector<2x32xf32>, vector<32x96xf32>, vector<2x96xf32> -> vector<2x96xf32>
    %138 = vector.broadcast %14 : vector<1x96xf32> to vector<2x96xf32>
    %139 = arith.addf %137, %138 : vector<2x96xf32>
    %140 = vector.extract_strided_slice %136 {offsets = [0, 0], sizes = [2, 64], strides = [1, 1]} : vector<2x96xf32> to vector<2x64xf32>
    %141 = vector.extract_strided_slice %139 {offsets = [0, 0], sizes = [2, 64], strides = [1, 1]} : vector<2x96xf32> to vector<2x64xf32>
    %142 = arith.addf %140, %141 : vector<2x64xf32>
    %143 = arith.negf %142 : vector<2x64xf32>
    %144 = math.exp %143 : vector<2x64xf32>
    %cst_25 = arith.constant 1.000000e+00 : f32
    %145 = vector.broadcast %cst_25 : f32 to vector<2x64xf32>
    %146 = arith.addf %145, %144 : vector<2x64xf32>
    %147 = arith.divf %145, %146 : vector<2x64xf32>
    %148 = vector.extract_strided_slice %147 {offsets = [0, 0], sizes = [2, 32], strides = [1, 1]} : vector<2x64xf32> to vector<2x32xf32>
    %149 = vector.extract_strided_slice %147 {offsets = [0, 32], sizes = [2, 32], strides = [1, 1]} : vector<2x64xf32> to vector<2x32xf32>
    %150 = vector.extract_strided_slice %136 {offsets = [0, 64], sizes = [2, 32], strides = [1, 1]} : vector<2x96xf32> to vector<2x32xf32>
    %151 = vector.extract_strided_slice %139 {offsets = [0, 64], sizes = [2, 32], strides = [1, 1]} : vector<2x96xf32> to vector<2x32xf32>
    %152 = arith.mulf %148, %151 : vector<2x32xf32>
    %153 = arith.addf %150, %152 : vector<2x32xf32>
    %154 = math.tanh %153 : vector<2x32xf32>
    %cst_26 = arith.constant 1.000000e+00 : f32
    %155 = vector.broadcast %cst_26 : f32 to vector<2x32xf32>
    %156 = arith.subf %155, %149 : vector<2x32xf32>
    %157 = arith.mulf %156, %154 : vector<2x32xf32>
    %158 = arith.mulf %149, %135 : vector<2x32xf32>
    %159 = arith.addf %157, %158 : vector<2x32xf32>
    %160 = vector.extract_strided_slice %12 {offsets = [12, 0], sizes = [2, 96], strides = [1, 1]} : vector<16x96xf32> to vector<2x96xf32>
    %cst_27 = arith.constant dense<0.000000e+00> : vector<2x96xf32>
    %161 = tpu.matmul %159, %13, %cst_27 {dimension_numbers = #tpu.dot_dimension_numbers<[1], [0], [0], [1], [0, 0, 1, 1], [], []>} : vector<2x32xf32>, vector<32x96xf32>, vector<2x96xf32> -> vector<2x96xf32>
    %162 = vector.broadcast %14 : vector<1x96xf32> to vector<2x96xf32>
    %163 = arith.addf %161, %162 : vector<2x96xf32>
    %164 = vector.extract_strided_slice %160 {offsets = [0, 0], sizes = [2, 64], strides = [1, 1]} : vector<2x96xf32> to vector<2x64xf32>
    %165 = vector.extract_strided_slice %163 {offsets = [0, 0], sizes = [2, 64], strides = [1, 1]} : vector<2x96xf32> to vector<2x64xf32>
    %166 = arith.addf %164, %165 : vector<2x64xf32>
    %167 = arith.negf %166 : vector<2x64xf32>
    %168 = math.exp %167 : vector<2x64xf32>
    %cst_28 = arith.constant 1.000000e+00 : f32
    %169 = vector.broadcast %cst_28 : f32 to vector<2x64xf32>
    %170 = arith.addf %169, %168 : vector<2x64xf32>
    %171 = arith.divf %169, %170 : vector<2x64xf32>
    %172 = vector.extract_strided_slice %171 {offsets = [0, 0], sizes = [2, 32], strides = [1, 1]} : vector<2x64xf32> to vector<2x32xf32>
    %173 = vector.extract_strided_slice %171 {offsets = [0, 32], sizes = [2, 32], strides = [1, 1]} : vector<2x64xf32> to vector<2x32xf32>
    %174 = vector.extract_strided_slice %160 {offsets = [0, 64], sizes = [2, 32], strides = [1, 1]} : vector<2x96xf32> to vector<2x32xf32>
    %175 = vector.extract_strided_slice %163 {offsets = [0, 64], sizes = [2, 32], strides = [1, 1]} : vector<2x96xf32> to vector<2x32xf32>
    %176 = arith.mulf %172, %175 : vector<2x32xf32>
    %177 = arith.addf %174, %176 : vector<2x32xf32>
    %178 = math.tanh %177 : vector<2x32xf32>
    %cst_29 = arith.constant 1.000000e+00 : f32
    %179 = vector.broadcast %cst_29 : f32 to vector<2x32xf32>
    %180 = arith.subf %179, %173 : vector<2x32xf32>
    %181 = arith.mulf %180, %178 : vector<2x32xf32>
    %182 = arith.mulf %173, %159 : vector<2x32xf32>
    %183 = arith.addf %181, %182 : vector<2x32xf32>
    %184 = vector.extract_strided_slice %12 {offsets = [14, 0], sizes = [2, 96], strides = [1, 1]} : vector<16x96xf32> to vector<2x96xf32>
    %cst_30 = arith.constant dense<0.000000e+00> : vector<2x96xf32>
    %185 = tpu.matmul %183, %13, %cst_30 {dimension_numbers = #tpu.dot_dimension_numbers<[1], [0], [0], [1], [0, 0, 1, 1], [], []>} : vector<2x32xf32>, vector<32x96xf32>, vector<2x96xf32> -> vector<2x96xf32>
    %186 = vector.broadcast %14 : vector<1x96xf32> to vector<2x96xf32>
    %187 = arith.addf %185, %186 : vector<2x96xf32>
    %188 = vector.extract_strided_slice %184 {offsets = [0, 0], sizes = [2, 64], strides = [1, 1]} : vector<2x96xf32> to vector<2x64xf32>
    %189 = vector.extract_strided_slice %187 {offsets = [0, 0], sizes = [2, 64], strides = [1, 1]} : vector<2x96xf32> to vector<2x64xf32>
    %190 = arith.addf %188, %189 : vector<2x64xf32>
    %191 = arith.negf %190 : vector<2x64xf32>
    %192 = math.exp %191 : vector<2x64xf32>
    %cst_31 = arith.constant 1.000000e+00 : f32
    %193 = vector.broadcast %cst_31 : f32 to vector<2x64xf32>
    %194 = arith.addf %193, %192 : vector<2x64xf32>
    %195 = arith.divf %193, %194 : vector<2x64xf32>
    %196 = vector.extract_strided_slice %195 {offsets = [0, 0], sizes = [2, 32], strides = [1, 1]} : vector<2x64xf32> to vector<2x32xf32>
    %197 = vector.extract_strided_slice %195 {offsets = [0, 32], sizes = [2, 32], strides = [1, 1]} : vector<2x64xf32> to vector<2x32xf32>
    %198 = vector.extract_strided_slice %184 {offsets = [0, 64], sizes = [2, 32], strides = [1, 1]} : vector<2x96xf32> to vector<2x32xf32>
    %199 = vector.extract_strided_slice %187 {offsets = [0, 64], sizes = [2, 32], strides = [1, 1]} : vector<2x96xf32> to vector<2x32xf32>
    %200 = arith.mulf %196, %199 : vector<2x32xf32>
    %201 = arith.addf %198, %200 : vector<2x32xf32>
    %202 = math.tanh %201 : vector<2x32xf32>
    %cst_32 = arith.constant 1.000000e+00 : f32
    %203 = vector.broadcast %cst_32 : f32 to vector<2x32xf32>
    %204 = arith.subf %203, %197 : vector<2x32xf32>
    %205 = arith.mulf %204, %202 : vector<2x32xf32>
    %206 = arith.mulf %197, %183 : vector<2x32xf32>
    %207 = arith.addf %205, %206 : vector<2x32xf32>
    %208 = tpu.concatenate %39, %63, %87, %111, %135, %159, %183, %207 in 0 : vector<2x32xf32>, vector<2x32xf32>, vector<2x32xf32>, vector<2x32xf32>, vector<2x32xf32>, vector<2x32xf32>, vector<2x32xf32>, vector<2x32xf32> -> vector<16x32xf32>
    %c104 = arith.constant 104 : index
    %c0_33 = arith.constant 0 : index
    %209 = vector.load %arg1[%c104, %c0_33] : memref<192x128xf32, #tpu.memory_space<vmem>>, vector<32x32xf32>
    %c136 = arith.constant 136 : index
    %c0_34 = arith.constant 0 : index
    %210 = vector.load %arg1[%c136, %c0_34] : memref<192x128xf32, #tpu.memory_space<vmem>>, vector<1x32xf32>
    %c144 = arith.constant 144 : index
    %c0_35 = arith.constant 0 : index
    %211 = vector.load %arg1[%c144, %c0_35] : memref<192x128xf32, #tpu.memory_space<vmem>>, vector<32x32xf32>
    %c176 = arith.constant 176 : index
    %c0_36 = arith.constant 0 : index
    %212 = vector.load %arg1[%c176, %c0_36] : memref<192x128xf32, #tpu.memory_space<vmem>>, vector<1x32xf32>
    %c184 = arith.constant 184 : index
    %c0_37 = arith.constant 0 : index
    %213 = vector.load %arg1[%c184, %c0_37] : memref<192x128xf32, #tpu.memory_space<vmem>>, vector<1x32xf32>
    %c185 = arith.constant 185 : index
    %c0_38 = arith.constant 0 : index
    %214 = vector.load %arg1[%c185, %c0_38] : memref<192x128xf32, #tpu.memory_space<vmem>>, vector<1x1xf32>
    %cst_39 = arith.constant dense<0.000000e+00> : vector<16x32xf32>
    %215 = tpu.matmul %208, %209, %cst_39 {dimension_numbers = #tpu.dot_dimension_numbers<[1], [0], [0], [1], [0, 0, 1, 1], [], []>} : vector<16x32xf32>, vector<32x32xf32>, vector<16x32xf32> -> vector<16x32xf32>
    %216 = vector.broadcast %210 : vector<1x32xf32> to vector<16x32xf32>
    %217 = arith.addf %215, %216 : vector<16x32xf32>
    %218 = math.tanh %217 : vector<16x32xf32>
    %cst_40 = arith.constant dense<0.000000e+00> : vector<16x32xf32>
    %219 = tpu.matmul %218, %211, %cst_40 {dimension_numbers = #tpu.dot_dimension_numbers<[1], [0], [0], [1], [0, 0, 1, 1], [], []>} : vector<16x32xf32>, vector<32x32xf32>, vector<16x32xf32> -> vector<16x32xf32>
    %220 = vector.broadcast %212 : vector<1x32xf32> to vector<16x32xf32>
    %221 = arith.addf %219, %220 : vector<16x32xf32>
    %222 = vector.broadcast %213 : vector<1x32xf32> to vector<16x32xf32>
    %223 = arith.mulf %221, %222 : vector<16x32xf32>
    %cst_41 = arith.constant dense<0.000000e+00> : vector<16xf32>
    %224 = vector.multi_reduction <add>, %223, %cst_41 [1] : vector<16x32xf32> to vector<16xf32>
    %225 = vector.shape_cast %224 : vector<16xf32> to vector<16x1xf32>
    %226 = vector.broadcast %225 : vector<16x1xf32> to vector<16x32xf32>
    %227 = arith.mulf %226, %208 : vector<16x32xf32>
    %228 = vector.extract_strided_slice %227 {offsets = [0, 0], sizes = [2, 32], strides = [1, 1]} : vector<16x32xf32> to vector<2x32xf32>
    %229 = vector.extract_strided_slice %227 {offsets = [2, 0], sizes = [2, 32], strides = [1, 1]} : vector<16x32xf32> to vector<2x32xf32>
    %230 = arith.addf %228, %229 : vector<2x32xf32>
    %231 = vector.extract_strided_slice %227 {offsets = [4, 0], sizes = [2, 32], strides = [1, 1]} : vector<16x32xf32> to vector<2x32xf32>
    %232 = arith.addf %230, %231 : vector<2x32xf32>
    %233 = vector.extract_strided_slice %227 {offsets = [6, 0], sizes = [2, 32], strides = [1, 1]} : vector<16x32xf32> to vector<2x32xf32>
    %234 = arith.addf %232, %233 : vector<2x32xf32>
    %235 = vector.extract_strided_slice %227 {offsets = [8, 0], sizes = [2, 32], strides = [1, 1]} : vector<16x32xf32> to vector<2x32xf32>
    %236 = arith.addf %234, %235 : vector<2x32xf32>
    %237 = vector.extract_strided_slice %227 {offsets = [10, 0], sizes = [2, 32], strides = [1, 1]} : vector<16x32xf32> to vector<2x32xf32>
    %238 = arith.addf %236, %237 : vector<2x32xf32>
    %239 = vector.extract_strided_slice %227 {offsets = [12, 0], sizes = [2, 32], strides = [1, 1]} : vector<16x32xf32> to vector<2x32xf32>
    %240 = arith.addf %238, %239 : vector<2x32xf32>
    %241 = vector.extract_strided_slice %227 {offsets = [14, 0], sizes = [2, 32], strides = [1, 1]} : vector<16x32xf32> to vector<2x32xf32>
    %242 = arith.addf %240, %241 : vector<2x32xf32>
    %243 = vector.broadcast %214 : vector<1x1xf32> to vector<2x32xf32>
    %244 = arith.addf %242, %243 : vector<2x32xf32>
    %cst_42 = arith.constant 0.000000e+00 : f32
    %245 = vector.broadcast %cst_42 : f32 to vector<16x32xf32>
    %246 = tpu.concatenate %208, %7, %221, %245 in 1 : vector<16x32xf32>, vector<16x32xf32>, vector<16x32xf32>, vector<16x32xf32> -> vector<16x128xf32>
    %cst_43 = arith.constant 0.000000e+00 : f32
    %247 = vector.broadcast %cst_43 : f32 to vector<2x96xf32>
    %248 = tpu.concatenate %244, %247 in 1 : vector<2x32xf32>, vector<2x96xf32> -> vector<2x128xf32>
    %249 = tpu.concatenate %246, %248 in 0 : vector<16x128xf32>, vector<2x128xf32> -> vector<18x128xf32>
    %c0_44 = arith.constant 0 : index
    %c0_45 = arith.constant 0 : index
    %250 = vector.load %arg2[%c0_44, %c0_45] : memref<18x128xf32, #tpu.memory_space<vmem>>, vector<18x128xf32>
    tpu.vector_store %arg2[%c0_44, %c0_45], %249 {strides = array<i32>} : memref<18x128xf32, #tpu.memory_space<vmem>>, vector<18x128xf32>,
    return
  }
}

</mosaic_0001>

<bundles_post_ra>
// kernel: encoder_t_forward.1
= control target key start
LH: loop header
LB: loop body
LE: loop exit
PB: predicated region body
PF: predicated region fallthrough
CT: control target
= control target key end

     0   :  { %7 = vsyncpa [#allocation3], 0  ;;  %s1724_s9 = smov [#allocation2]   ;;  %s1947_s0 = inlined_call_operand.vmem [shape: s32[16,1], index: 0, kind: input, shape index: {}]   ;;  %s1948_s1 = inlined_call_operand.hbm [shape: f32[192,128], index: 1, kind: input, shape index: {}]   ;;  %s1949_s2 = inlined_call_operand.vmem [shape: f32[18,128], index: 2, kind: output, shape index: {}]  }
   0x1   :  { %s15_s10 = sshll.u32 %s1724_s9, 4  ;;  %s1700_s13 = scalar_lea.hbm %s1948_s1, 3072  ;;  %s16_s10 = int_to_ptr.vmem [resolvable:$true] %s15_s10 }
   0x2   :  { %p1701_p0 = scmp.ne.s32.totalorder %s1948_s1, %s1700_s13  ;;  %p1704_p1 = scmp.lt.u32.totalorder %s1700_s13, %s1948_s1 }
   0x4   :  { %p1706_p2 = pnand %p1704_p1, %p1701_p0 }
   0x6   :  { %1709 = shalt.err (!%p1706_p2)
}
   0x7   :  { %s1710_s18 = scalar_lea.vmem %s16_s10, 3072  ;;  %p1715_p4 = scmp.lt.s32.totalorder %s16_s10, %s16_s10 }
   0x8   :  { %p1711_p3 = scmp.ne.s32.totalorder %s16_s10, %s1710_s18  ;;  %p1716_p5 = scmp.lt.s32.totalorder %s1710_s18, %s1710_s18 }
   0xa   :  { %p1717_p6 = por %p1716_p5, %p1715_p4 }
   0xc   :  { %p1718_p7 = pnand %p1717_p6, %p1711_p3 }
   0xe   :  { %1721 = shalt.err (!%p1718_p7)
}
   0xf   :  { %s1725_s19 = smov 128   ;;  %s1726_s20 = smov 8  }
  0x10   :  { %21 = dma.hbm_to_vmem [thread:$0]  %s1948_s1, 3072, %s16_s10, [#allocation3], %s1725_s19, %s1725_s19, %s1726_s20  }
  0x11   :  { %1722 = dma.done.wait [#allocation3], 3072  }
  0x12   :  { %1723 = vsyncadd [#allocation3], 4294964224  ;;  %v1727_v0 = vmov 0   ;;  %v25_v1 = vld [vmem:[%s1947_s0] sm:$0xff]  ;;  %v42_v3 = vld [vmem:[#allocation2 + $0x8] sm:$0xff]  ;;  %v1728_v7 = vmov 0.0|0.0   ;;  %v27_v14 = vlaneseq }
  0x13   :  { %1647 = vset.pattern.permute.xlu0 %v1727_v0  ;;  %v41_v2 = vld [vmem:[#allocation2] sm:$0xff]  ;;  %v26_v4 = vld [vmem:[%s1947_s0 + $0x8] sm:$0xff]  ;;  %v43_v6 = vld [vmem:[#allocation2 + $0x10] sm:$0xff]  ;;  %vm44_vm0 = vcmask 195584   ;;  %v1729_v19 = vmov 0.0   ;;  %vm1730_vm3 = vmmov 0  }
  0x14   :  { %30 = vperm.xlu0 %1647, %v25_v1   ;;  %v1559_v5 = vpack.c.bf16 %v42_v3, %v41_v2  ;;  %v126_v8 = vld [vmem:[#allocation2 + $0x18] sm:$0xff]  ;;  %v127_v9 = vld [vmem:[#allocation2 + $0x20] sm:$0xff]  ;;  %v128_v10 = vld [vmem:[#allocation2 + $0x28] sm:$0xff]  ;;  %v28_v15 = vand.u32 127, %v27_v14  ;;  %vm135_vm4 = vcmask 261120   ;;  %s1731_s0 = smov 64  }
  0x15   :  { %v1563_v11 = vpack.c.bf16 %v127_v9, %v126_v8  ;;  %v129_v12 = vld [vmem:[#allocation2 + $0x30] sm:$0xff]  ;;  %v217_v17 = vld [vmem:[#allocation2 + $0x38] sm:$0xff]  ;;  %v218_v18 = vld [vmem:[#allocation2 + $0x40] sm:$0xff]  ;;  %s1732_s1 = smov 96   ;;  %vm1062_vm5 = vcmask 1041408   ;;  %vm1064_vm6 = vcmask 1043456  }
  0x16   :  { %1560 = vmatprep.subr.bf16.mxu0 %v1559_v5  ;;  %v1567_v13 = vpack.c.bf16 %v129_v12, %v128_v10  ;;  %v1770_v22 = vpack.c.bf16 %v218_v18, %v217_v17  ;;  %v219_v23 = vld [vmem:[#allocation2 + $0x48] sm:$0xff]  ;;  %v220_v24 = vld [vmem:[#allocation2 + $0x50] sm:$0xff]  ;;  %v1800_v29 = vld [vmem:[#allocation2 + $0x60] ss:$0 sm:$0xff]  ;;  %vm1066_vm7 = vcmask 1045504   ;;  %s1733_s27 = smov 32  }
  0x17   :  { %1562 = vmatpush3.bf16.msra.mxu0 %v1559_v5  ;;  %1564 = vmatprep.subr.bf16.mxu1 %v1563_v11  ;;  %v1774_v26 = vpack.c.bf16 %v220_v24, %v219_v23  ;;  %v1340_v33 = vld [vmem:[#allocation2 + $0x58] ss:$0 sm:$0xff]  ;;  %vm1317_vm8 = vcmask 523264   ;;  %vm1320_vm9 = vcmask 785408  }
  0x18   :  { %33 = vperm.xlu0 %1647, %v26_v4   ;;  %1433 = vmatprep.subr.mxu0 %v43_v6 }
  0x19   :  { %1566 = vmatpush3.bf16.msra.mxu1 %v1563_v11 }
  0x1a   :  { %1568 = vmatprep.subr.bf16.mxu1 %v1567_v13 }
  0x1b   :  { %1434 = vmatpush3.msra.mxu0 %v43_v6 }
  0x1c   :  { %1571 = vmatprep.subr.bf16.mxu0 %v1728_v7 }
  0x1d   :  { %1570 = vmatpush3.bf16.msra.mxu1 %v1567_v13 }
  0x1e   :  { %1577 = vmatprep.subr.bf16.mxu1 %v1728_v7 }
  0x93   :  { %v31_v16 = vpop.permute.xlu0 %30 }
  0x94   :  { %vm35_vm1 = vcmp.eq.s32.totalorder %v31_v16, %v28_v15 }
  0x95   :  { %v1336_v20 = vsel %vm35_vm1, 1.0, %v1729_v19 }
  0x96   :  { %1435 = vmatprep.mubr.msk.f32.mxu0 %vm44_vm0, %v1336_v20 }
  0x97   :  { %v34_v21 = vpop.permute.xlu0 %33 }
  0x98   :  { %vm36_vm2 = vcmp.eq.s32.totalorder %v34_v21, %v28_v15 }
  0x99   :  { %v1337_v25 = vsel %vm36_vm2, 1.0, %v1729_v19 }
  0x9a   :  { %1436 = vmatmul.mubr.msk.f32.vlgmr.msra.gmra.mrb[0].mxu0 %vm44_vm0, %v1337_v25 }
  0x9b   :  { %1573 = vmatpush3.bf16.msra.mxu0 %v1770_v22  ;;  %1457 = vmatprep.mubr.msk.f32.mxu0 %vm1730_vm3, %v1729_v19 }
  0x9c   :  { %1574 = vmatprep.subr.bf16.mxu0 %v1728_v7 }
  0x9f   :  { %1576 = vmatpush3.bf16.msra.mxu0 %v1774_v26 }
  0xa0   :  { %1583 = vmatprep.subr.bf16.mxu0 %v1728_v7 }
  0xa2   :  { %1458 = vmatmul.mubr.f32.vlgmr.msra.gmra.mrb[2].mxu0 %v1729_v19 }
  0xa3   :  { %1585 = vmatpush3.bf16.msra.mxu0 %v1770_v22  ;;  %1479 = vmatprep.mubr.msk.f32.mxu0 %vm1730_vm3, %v1729_v19 }
  0xa4   :  { %1586 = vmatprep.subr.bf16.mxu0 %v1728_v7 }
  0xa7   :  { %1588 = vmatpush3.bf16.msra.mxu0 %v1774_v26 }
  0xa8   :  { %1595 = vmatprep.subr.bf16.mxu0 %v1728_v7 }
 0x16d   :  { %v1788_v27 = vpop.f32.mrb[0].mxu0 }
 0x16e   :  { %v1790_v28 = vpop.f32.mrb[1].mxu0 }
 0x16f   :  { %1446 = vmatprep.mubr.msk.f32.mxu1 %vm135_vm4, %v1790_v28 }
 0x170   :  { %1447 = vmatmul.mubr.msk.f32.vlgmr.msra.gmra.mrb[0].mxu1 %vm135_vm4, %v1788_v27 }
 0x171   :  { %1579 = vmatpush3.bf16.msra.mxu1 %v1770_v22  ;;  %1468 = vmatprep.mubr.msk.f32.mxu1 %vm1730_vm3, %v1729_v19 }
 0x172   :  { %1580 = vmatprep.subr.bf16.mxu1 %v1728_v7 }
 0x175   :  { %v295_v30 = vpop.f32.mrb[2].mxu0  ;;  %1582 = vmatpush3.bf16.msra.mxu1 %v1774_v26 }
 0x176   :  { %v296_v31 = vadd.f32 %v1800_v29, %v295_v30  ;;  %v1459_v32 = vpop.f32.mrb[3].mxu0  ;;  %1589 = vmatprep.subr.bf16.mxu1 %v1728_v7 }
 0x178   :  { %307 = vrot.lane.b32.xlu1 %v296_v31, %s1731_s0 }
 0x1ea   :  { %v308_v42 = vpop.permute.xlu1 %307 }
 0x243   :  { %v1448_v34 = vpop.f32.mrb[0].mxu1 }
 0x244   :  { %v1806_v35 = vadd.f32 %v1448_v34, %v1340_v33  ;;  %v208_v36 = vpop.f32.mrb[1].mxu1 }
 0x245   :  { %v1808_v37 = vadd.f32 %v1340_v33, %v208_v36 }
 0x247   :  { %v299_v38 = vadd.f32 %v296_v31, %v1808_v37 }
 0x249   :  { %v1344_v39 = vmul.f32 -1.442695, %v299_v38 }
 0x24b   :  { %1648 = vpow2.f32 %v1344_v39 }
 0x255   :  { %v1649_v40 = vpop.eup %1648 }
 0x256   :  { %v303_v41 = vadd.f32 1.0, %v1649_v40 }
 0x258   :  { %1650 = vrcp.f32 %v303_v41 }
 0x262   :  { %v1651_v43 = vpop.eup %1650 }
 0x263   :  { %v310_v44 = vmul.f32 %v1651_v43, %v308_v42  ;;  %v317_v48 = vsub.f32 1.0, %v1651_v43  ;;  %v323_v50 = vmul.f32 0.0, %v1651_v43 }
 0x265   :  { %312 = vrot.lane.b32.xlu1 %v310_v44, %s1731_s0 }
 0x2d7   :  { %v313_v45 = vpop.permute.xlu1 %312 }
 0x2d8   :  { %v315_v46 = vadd.f32 %v313_v45, %v1808_v37 }
 0x2da   :  { %1652 = vtanh.f32 %v315_v46 }
 0x2e4   :  { %v1653_v47 = vpop.eup %1652 }
 0x2e5   :  { %319 = vrot.lane.b32.xlu0 %v1653_v47, %s1732_s1 }
 0x357   :  { %v320_v49 = vpop.permute.xlu0 %319 }
 0x358   :  { %v322_v51 = vmul.f32 %v320_v49, %v317_v48 }
 0x35a   :  { %v1814_v52 = vadd.f32 %v323_v50, %v322_v51 }
 0x35c   :  { %326 = vrot.lane.b32.xlu1 %v1814_v52, %s1732_s1  ;;  %v426_v5 = vrot.slane %v1814_v52, 6 }
 0x3ce   :  { %v327_v53 = vpop.permute.xlu1 %326 }
 0x3cf   :  { %1469 = vmatmul.mubr.msk.f32.vlgmr.msra.gmra.mrb[2].mxu1 %vm135_vm4, %v327_v53 }
 0x3d0   :  { %1591 = vmatpush3.bf16.msra.mxu1 %v1770_v22  ;;  %1490 = vmatprep.mubr.msk.f32.mxu1 %vm1730_vm3, %v1729_v19 }
 0x3d1   :  { %1592 = vmatprep.subr.bf16.mxu1 %v1728_v7 }
 0x3d4   :  { %1594 = vmatpush3.bf16.msra.mxu1 %v1774_v26 }
 0x3d5   :  { %1601 = vmatprep.subr.bf16.mxu1 %v1728_v7 }
 0x4a2   :  { %v396_v54 = vpop.f32.mrb[2].mxu1 }
 0x4a3   :  { %v397_v55 = vadd.f32 %v1800_v29, %v396_v54  ;;  %v1470_v56 = vpop.f32.mrb[3].mxu1 }
 0x4a5   :  { %v401_v57 = vrot.slane %v397_v55, 6 }
 0x4a7   :  { %410 = vrot.lane.b32.xlu0 %v401_v57, %s1731_s0  ;;  %v403_v58 = vadd.f32 %v401_v57, %v1808_v37 }
 0x4a9   :  { %v1346_v59 = vmul.f32 -1.442695, %v403_v58 }
 0x4ab   :  { %1654 = vpow2.f32 %v1346_v59 }
 0x4b5   :  { %v1655_v60 = vpop.eup %1654 }
 0x4b6   :  { %v407_v61 = vadd.f32 1.0, %v1655_v60 }
 0x4b8   :  { %1656 = vrcp.f32 %v407_v61 }
 0x4c2   :  { %v1657_v62 = vpop.eup %1656 }
 0x4c3   :  { %v420_v4 = vsub.f32 1.0, %v1657_v62  ;;  %v428_v9 = vmul.f32 %v1657_v62, %v426_v5 }
 0x519   :  { %v411_v63 = vpop.permute.xlu0 %410 }
 0x51a   :  { %v413_v0 = vmul.f32 %v1657_v62, %v411_v63 }
 0x51c   :  { %415 = vrot.lane.b32.xlu1 %v413_v0, %s1731_s0 }
 0x58e   :  { %v416_v1 = vpop.permute.xlu1 %415 }
 0x58f   :  { %v418_v2 = vadd.f32 %v416_v1, %v1808_v37 }
 0x591   :  { %1658 = vtanh.f32 %v418_v2 }
 0x59b   :  { %v1659_v3 = vpop.eup %1658 }
 0x59c   :  { %422 = vrot.lane.b32.xlu0 %v1659_v3, %s1732_s1 }
 0x60e   :  { %v423_v6 = vpop.permute.xlu0 %422 }
 0x60f   :  { %v425_v8 = vmul.f32 %v423_v6, %v420_v4 }
 0x611   :  { %v429_v10 = vadd.f32 %v428_v9, %v425_v8 }
 0x613   :  { %v431_v11 = vrot.slane %v429_v10, 2  ;;  %v532_v34 = vrot.slane %v429_v10, 6  ;;  %v1063_v41 = vsel %vm1062_vm5, %v1814_v52, %v429_v10 }
 0x615   :  { %432 = vrot.lane.b32.xlu1 %v431_v11, %s1732_s1 }
 0x687   :  { %v433_v12 = vpop.permute.xlu1 %432 }
 0x688   :  { %1480 = vmatmul.mubr.msk.f32.vlgmr.msra.gmra.mrb[4].mxu0 %vm135_vm4, %v433_v12 }
 0x689   :  { %1597 = vmatpush3.bf16.msra.mxu0 %v1770_v22  ;;  %1501 = vmatprep.mubr.msk.f32.mxu0 %vm1730_vm3, %v1729_v19 }
 0x68a   :  { %1598 = vmatprep.subr.bf16.mxu0 %v1728_v7 }
 0x68d   :  { %1600 = vmatpush3.bf16.msra.mxu0 %v1774_v26 }
 0x68e   :  { %1607 = vmatprep.subr.bf16.mxu0 %v1728_v7 }
 0x75b   :  { %v502_v13 = vpop.f32.mrb[4].mxu0 }
 0x75c   :  { %v503_v14 = vadd.f32 %v1800_v29, %v502_v13  ;;  %v1481_v15 = vpop.f32.mrb[5].mxu0 }
 0x75e   :  { %v507_v16 = vrot.slane %v503_v14, 4 }
 0x760   :  { %516 = vrot.lane.b32.xlu0 %v507_v16, %s1731_s0  ;;  %v509_v17 = vadd.f32 %v507_v16, %v1808_v37 }
 0x762   :  { %v1348_v18 = vmul.f32 -1.442695, %v509_v17 }
 0x764   :  { %1660 = vpow2.f32 %v1348_v18 }
 0x76e   :  { %v1661_v20 = vpop.eup %1660 }
 0x76f   :  { %v513_v21 = vadd.f32 1.0, %v1661_v20 }
 0x771   :  { %1662 = vrcp.f32 %v513_v21 }
 0x77b   :  { %v1663_v23 = vpop.eup %1662 }
 0x77c   :  { %v526_v33 = vsub.f32 1.0, %v1663_v23  ;;  %v534_v38 = vmul.f32 %v1663_v23, %v532_v34 }
 0x7d2   :  { %v517_v24 = vpop.permute.xlu0 %516 }
 0x7d3   :  { %v519_v25 = vmul.f32 %v1663_v23, %v517_v24 }
 0x7d5   :  { %521 = vrot.lane.b32.xlu1 %v519_v25, %s1731_s0 }
 0x847   :  { %v522_v30 = vpop.permute.xlu1 %521 }
 0x848   :  { %v524_v31 = vadd.f32 %v522_v30, %v1808_v37 }
 0x84a   :  { %1664 = vtanh.f32 %v524_v31 }
 0x854   :  { %v1665_v32 = vpop.eup %1664 }
 0x855   :  { %528 = vrot.lane.b32.xlu0 %v1665_v32, %s1732_s1 }
 0x8c7   :  { %v529_v36 = vpop.permute.xlu0 %528 }
 0x8c8   :  { %v531_v39 = vmul.f32 %v529_v36, %v526_v33 }
 0x8ca   :  { %v535_v40 = vadd.f32 %v534_v38, %v531_v39 }
 0x8cc   :  { %v537_v42 = vrot.slane %v535_v40, 4  ;;  %v1065_v43 = vsel %vm1064_vm6, %v1063_v41, %v535_v40  ;;  %v638_v60 = vrot.slane %v535_v40, 6 }
 0x8ce   :  { %538 = vrot.lane.b32.xlu1 %v537_v42, %s1732_s1 }
 0x940   :  { %v539_v44 = vpop.permute.xlu1 %538 }
 0x941   :  { %1491 = vmatmul.mubr.msk.f32.vlgmr.msra.gmra.mrb[4].mxu1 %vm135_vm4, %v539_v44 }
 0x942   :  { %1603 = vmatpush3.bf16.msra.mxu1 %v1770_v22  ;;  %1512 = vmatprep.mubr.msk.f32.mxu1 %vm1730_vm3, %v1729_v19 }
 0x943   :  { %1604 = vmatprep.subr.bf16.mxu1 %v1728_v7 }
 0x946   :  { %1606 = vmatpush3.bf16.msra.mxu1 %v1774_v26 }
 0x947   :  { %1613 = vmatprep.subr.bf16.mxu1 %v1728_v7 }
 0xa14   :  { %v608_v45 = vpop.f32.mrb[4].mxu1 }
 0xa15   :  { %v609_v46 = vadd.f32 %v1800_v29, %v608_v45  ;;  %v1492_v47 = vpop.f32.mrb[5].mxu1 }
 0xa17   :  { %v613_v48 = vrot.slane %v609_v46, 2 }
 0xa19   :  { %622 = vrot.lane.b32.xlu0 %v613_v48, %s1731_s0  ;;  %v615_v49 = vadd.f32 %v613_v48, %v1808_v37 }
 0xa1b   :  { %v1350_v50 = vmul.f32 -1.442695, %v615_v49 }
 0xa1d   :  { %1666 = vpow2.f32 %v1350_v50 }
 0xa27   :  { %v1667_v51 = vpop.eup %1666 }
 0xa28   :  { %v619_v52 = vadd.f32 1.0, %v1667_v51 }
 0xa2a   :  { %1668 = vrcp.f32 %v619_v52 }
 0xa34   :  { %v1669_v53 = vpop.eup %1668 }
 0xa35   :  { %v632_v59 = vsub.f32 1.0, %v1669_v53  ;;  %v640_v62 = vmul.f32 %v1669_v53, %v638_v60 }
 0xa8b   :  { %v623_v54 = vpop.permute.xlu0 %622 }
 0xa8c   :  { %v625_v55 = vmul.f32 %v1669_v53, %v623_v54 }
 0xa8e   :  { %627 = vrot.lane.b32.xlu1 %v625_v55, %s1731_s0 }
 0xb00   :  { %v628_v56 = vpop.permute.xlu1 %627 }
 0xb01   :  { %v630_v57 = vadd.f32 %v628_v56, %v1808_v37 }
 0xb03   :  { %1670 = vtanh.f32 %v630_v57 }
 0xb0d   :  { %v1671_v58 = vpop.eup %1670 }
 0xb0e   :  { %634 = vrot.lane.b32.xlu0 %v1671_v58, %s1732_s1 }
 0xb80   :  { %v635_v61 = vpop.permute.xlu0 %634 }
 0xb81   :  { %v637_v63 = vmul.f32 %v635_v61, %v632_v59 }
 0xb83   :  { %v641_v0 = vadd.f32 %v640_v62, %v637_v63 }
 0xb85   :  { %v643_v1 = vrot.slane %v641_v0, 6  ;;  %v1864_v2 = vsel %vm1066_vm7, %v1065_v43, %v641_v0 }
 0xb87   :  { %644 = vrot.lane.b32.xlu1 %v643_v1, %s1732_s1 }
 0xbf9   :  { %v645_v3 = vpop.permute.xlu1 %644 }
 0xbfa   :  { %1502 = vmatmul.mubr.msk.f32.vlgmr.msra.gmra.mrb[6].mxu0 %vm135_vm4, %v645_v3 }
 0xbfb   :  { %1609 = vmatpush3.bf16.msra.mxu0 %v1770_v22  ;;  %1523 = vmatprep.mubr.msk.f32.mxu0 %vm1730_vm3, %v1729_v19 }
 0xbfc   :  { %1610 = vmatprep.subr.bf16.mxu0 %v1728_v7 }
 0xbff   :  { %1612 = vmatpush3.bf16.msra.mxu0 %v1774_v26 }
 0xccd   :  { %v714_v37 = vpop.f32.mrb[6].mxu0 }
 0xcce   :  { %v715_v4 = vadd.f32 %v1800_v29, %v714_v37  ;;  %v1503_v5 = vpop.f32.mrb[7].mxu0 }
 0xcd0   :  { %726 = vrot.lane.b32.xlu0 %v715_v4, %s1731_s0  ;;  %v718_v6 = vadd.f32 %v715_v4, %v1806_v35 }
 0xcd2   :  { %v1352_v8 = vmul.f32 -1.442695, %v718_v6 }
 0xcd4   :  { %1672 = vpow2.f32 %v1352_v8 }
 0xcde   :  { %v1673_v9 = vpop.eup %1672 }
 0xcdf   :  { %v722_v10 = vadd.f32 1.0, %v1673_v9 }
 0xce1   :  { %1674 = vrcp.f32 %v722_v10 }
 0xceb   :  { %v1675_v11 = vpop.eup %1674 }
 0xcec   :  { %v736_v17 = vsub.f32 1.0, %v1675_v11  ;;  %v743_v20 = vmul.f32 %v1675_v11, %v643_v1 }
 0xd42   :  { %v727_v12 = vpop.permute.xlu0 %726 }
 0xd43   :  { %v729_v13 = vmul.f32 %v1675_v11, %v727_v12 }
 0xd45   :  { %731 = vrot.lane.b32.xlu1 %v729_v13, %s1731_s0 }
 0xdb7   :  { %v732_v14 = vpop.permute.xlu1 %731 }
 0xdb8   :  { %v734_v15 = vadd.f32 %v732_v14, %v1806_v35 }
 0xdba   :  { %1676 = vtanh.f32 %v734_v15 }
 0xdc4   :  { %v1677_v16 = vpop.eup %1676 }
 0xdc5   :  { %738 = vrot.lane.b32.xlu0 %v1677_v16, %s1732_s1 }
 0xe37   :  { %v739_v18 = vpop.permute.xlu0 %738 }
 0xe38   :  { %v741_v21 = vmul.f32 %v739_v18, %v736_v17 }
 0xe3a   :  { %v1879_v23 = vadd.f32 %v743_v20, %v741_v21 }
 0xe3c   :  { %746 = vrot.lane.b32.xlu1 %v1879_v23, %s1732_s1  ;;  %v846_v42 = vrot.slane %v1879_v23, 6 }
 0xeae   :  { %v747_v24 = vpop.permute.xlu1 %746 }
 0xeaf   :  { %1513 = vmatmul.mubr.msk.f32.vlgmr.msra.gmra.mrb[6].mxu1 %vm135_vm4, %v747_v24 }
 0xeb0   :  { %1615 = vmatpush3.bf16.msra.mxu1 %v1770_v22  ;;  %1534 = vmatprep.mubr.msk.f32.mxu1 %vm1730_vm3, %v1729_v19 }
 0xeb1   :  { %1616 = vmatprep.subr.bf16.mxu1 %v1728_v7 }
 0xeb4   :  { %1618 = vmatpush3.bf16.msra.mxu1 %v1774_v26 }
 0xf82   :  { %v816_v25 = vpop.f32.mrb[6].mxu1 }
 0xf83   :  { %v817_v30 = vadd.f32 %v1800_v29, %v816_v25  ;;  %v1514_v31 = vpop.f32.mrb[7].mxu1  ;;  %v1071_v25 = vld [vmem:[#allocation2 + $0x68] sm:$0xff] }
 0xf84   :  { %v1073_v31 = vld [vmem:[#allocation2 + $0x78] sm:$0xff] }
 0xf85   :  { %v821_v32 = vrot.slane %v817_v30, 6  ;;  %v1072_v30 = vld [vmem:[#allocation2 + $0x70] sm:$0xff] }
 0xf87   :  { %830 = vrot.lane.b32.xlu0 %v821_v32, %s1731_s0  ;;  %v823_v33 = vadd.f32 %v821_v32, %v1806_v35  ;;  %v1619_v32 = vpack.c.bf16 %v1072_v30, %v1071_v25 }
 0xf89   :  { %v1354_v34 = vmul.f32 -1.442695, %v823_v33  ;;  %v1074_v33 = vld [vmem:[#allocation2 + $0x80] sm:$0xff]  ;;  %1620 = vmatprep.subr.bf16.mxu0 %v1619_v32 }
 0xf8b   :  { %1678 = vpow2.f32 %v1354_v34  ;;  %v1623_v34 = vpack.c.bf16 %v1074_v33, %v1073_v31 }
 0xf95   :  { %v1679_v36 = vpop.eup %1678 }
 0xf96   :  { %v827_v22 = vadd.f32 1.0, %v1679_v36 }
 0xf98   :  { %1680 = vrcp.f32 %v827_v22 }
 0xfa2   :  { %v1681_v38 = vpop.eup %1680 }
 0xfa3   :  { %v840_v41 = vsub.f32 1.0, %v1681_v38  ;;  %v848_v45 = vmul.f32 %v1681_v38, %v846_v42  ;;  %v1077_v42 = vld [vmem:[#allocation2 + $0x98] sm:$0xff] }
 0xff9   :  { %v831_v19 = vpop.permute.xlu0 %830 }
 0xffa   :  { %v833_v39 = vmul.f32 %v1681_v38, %v831_v19 }
 0xffc   :  { %835 = vrot.lane.b32.xlu1 %v833_v39, %s1731_s0 }
0x106e   :  { %v836_v7 = vpop.permute.xlu1 %835 }
0x106f   :  { %v838_v26 = vadd.f32 %v836_v7, %v1806_v35 }
0x1071   :  { %1682 = vtanh.f32 %v838_v26 }
0x107b   :  { %v1683_v40 = vpop.eup %1682 }
0x107c   :  { %842 = vrot.lane.b32.xlu0 %v1683_v40, %s1732_s1 }
0x10ee   :  { %v843_v43 = vpop.permute.xlu0 %842 }
0x10ef   :  { %v845_v44 = vmul.f32 %v843_v43, %v840_v41  ;;  %v1076_v41 = vld [vmem:[#allocation2 + $0x90] sm:$0xff]  ;;  %v1078_v43 = vld [vmem:[#allocation2 + $0xa0] sm:$0xff] }
0x10f1   :  { %v849_v46 = vadd.f32 %v848_v45, %v845_v44  ;;  %v1627_v44 = vpack.c.bf16 %v1077_v42, %v1076_v41  ;;  %v1079_v45 = vld [vmem:[#allocation2 + $0xa8] sm:$0xff] }
0x10f3   :  { %v851_v47 = vrot.slane %v849_v46, 2  ;;  %v952_v0 = vrot.slane %v849_v46, 6  ;;  %v1068_v5 = vsel %vm1062_vm5, %v1879_v23, %v849_v46  ;;  %v1631_v46 = vpack.c.bf16 %v1079_v45, %v1078_v43  ;;  %1628 = vmatprep.subr.bf16.mxu1 %v1627_v44 }
0x10f5   :  { %852 = vrot.lane.b32.xlu1 %v851_v47, %s1732_s1  ;;  %v1359_v47 = vld [vmem:[#allocation2 + $0x88] ss:$0 sm:$0xff] }
0x1167   :  { %v853_v48 = vpop.permute.xlu1 %852 }
0x1168   :  { %1524 = vmatmul.mubr.msk.f32.vlgmr.msra.gmra.mrb[8].mxu0 %vm135_vm4, %v853_v48 }
0x1169   :  { %1622 = vmatpush3.bf16.msra.mxu0 %v1619_v32 }
0x116a   :  { %1624 = vmatprep.subr.bf16.mxu0 %v1623_v34 }
0x116d   :  { %1626 = vmatpush3.bf16.msra.mxu0 %v1623_v34 }
0x123b   :  { %v922_v49 = vpop.f32.mrb[8].mxu0 }
0x123c   :  { %v923_v50 = vadd.f32 %v1800_v29, %v922_v49  ;;  %v1525_v51 = vpop.f32.mrb[9].mxu0 }
0x123e   :  { %v927_v52 = vrot.slane %v923_v50, 4 }
0x1240   :  { %936 = vrot.lane.b32.xlu0 %v927_v52, %s1731_s0  ;;  %v929_v53 = vadd.f32 %v927_v52, %v1806_v35 }
0x1242   :  { %v1356_v54 = vmul.f32 -1.442695, %v929_v53 }
0x1244   :  { %1684 = vpow2.f32 %v1356_v54  ;;  %v1082_v54 = vld [vmem:[#allocation2 + $0xb9] sm:$0x1] }
0x1245   :  { %1635 = vpush %v1082_v54 }
0x124e   :  { %v1685_v55 = vpop.eup %1684 }
0x124f   :  { %v933_v56 = vadd.f32 1.0, %v1685_v55  ;;  %v1362_v55 = vld [vmem:[#allocation2 + $0xb0] ss:$0 sm:$0xff] }
0x1251   :  { %1686 = vrcp.f32 %v933_v56 }
0x125b   :  { %v1687_v57 = vpop.eup %1686 }
0x125c   :  { %v946_v63 = vsub.f32 1.0, %v1687_v57  ;;  %v954_v3 = vmul.f32 %v1687_v57, %v952_v0 }
0x1276   :  { %s1636_s4 = spop %1635 }
0x1277   :  { %v1296_v30 = vstv %s1636_s4 }
0x12b2   :  { %v937_v58 = vpop.permute.xlu0 %936 }
0x12b3   :  { %v939_v59 = vmul.f32 %v1687_v57, %v937_v58  ;;  %v1365_v57 = vld [vmem:[#allocation2 + $0xb8] ss:$0 sm:$0xff] }
0x12b5   :  { %941 = vrot.lane.b32.xlu1 %v939_v59, %s1731_s0 }
0x1327   :  { %v942_v60 = vpop.permute.xlu1 %941 }
0x1328   :  { %v944_v61 = vadd.f32 %v942_v60, %v1806_v35 }
0x132a   :  { %1688 = vtanh.f32 %v944_v61 }
0x1334   :  { %v1689_v62 = vpop.eup %1688 }
0x1335   :  { %948 = vrot.lane.b32.xlu0 %v1689_v62, %s1732_s1 }
0x13a7   :  { %v949_v1 = vpop.permute.xlu0 %948 }
0x13a8   :  { %v951_v37 = vmul.f32 %v949_v1, %v946_v63 }
0x13aa   :  { %v955_v4 = vadd.f32 %v954_v3, %v951_v37 }
0x13ac   :  { %v957_v6 = vrot.slane %v955_v4, 4  ;;  %v1069_v8 = vsel %vm1064_vm6, %v1068_v5, %v955_v4  ;;  %v1058_v22 = vrot.slane %v955_v4, 6 }
0x13ae   :  { %958 = vrot.lane.b32.xlu1 %v957_v6, %s1732_s1 }
0x1420   :  { %v959_v9 = vpop.permute.xlu1 %958 }
0x1421   :  { %1535 = vmatmul.mubr.msk.f32.vlgmr.msra.gmra.mrb[8].mxu1 %vm135_vm4, %v959_v9 }
0x1422   :  { %1630 = vmatpush3.bf16.msra.mxu1 %v1627_v44 }
0x1423   :  { %1632 = vmatprep.subr.bf16.mxu1 %v1631_v46 }
0x1426   :  { %1634 = vmatpush3.bf16.msra.mxu1 %v1631_v46 }
0x14f4   :  { %v1028_v10 = vpop.f32.mrb[8].mxu1 }
0x14f5   :  { %v1029_v11 = vadd.f32 %v1800_v29, %v1028_v10  ;;  %v1536_v12 = vpop.f32.mrb[9].mxu1 }
0x14f7   :  { %v1033_v13 = vrot.slane %v1029_v11, 2 }
0x14f9   :  { %1042 = vrot.lane.b32.xlu0 %v1033_v13, %s1731_s0  ;;  %v1035_v14 = vadd.f32 %v1033_v13, %v1806_v35 }
0x14fb   :  { %v1358_v15 = vmul.f32 -1.442695, %v1035_v14 }
0x14fd   :  { %1690 = vpow2.f32 %v1358_v15 }
0x1507   :  { %v1691_v16 = vpop.eup %1690 }
0x1508   :  { %v1039_v17 = vadd.f32 1.0, %v1691_v16 }
0x150a   :  { %1692 = vrcp.f32 %v1039_v17 }
0x1514   :  { %v1693_v18 = vpop.eup %1692 }
0x1515   :  { %v1060_v19 = vmul.f32 %v1693_v18, %v1058_v22 }
0x156b   :  { %v1043_v20 = vpop.permute.xlu0 %1042 }
0x156c   :  { %v1045_v21 = vmul.f32 %v1693_v18, %v1043_v20 }
0x156e   :  { %1047 = vrot.lane.b32.xlu1 %v1045_v21, %s1731_s0 }
0x1572   :  { %1089 = vrot.lane.b32.xlu1 %v1864_v2, %s1732_s1 }
0x15e0   :  { %v1048_v29 = vpop.permute.xlu1 %1047 }
0x15e1   :  { %v1050_v23 = vadd.f32 %v1048_v29, %v1806_v35  ;;  %v1052_v35 = vsub.f32 1.0, %v1693_v18 }
0x15e3   :  { %1694 = vtanh.f32 %v1050_v23 }
0x15e4   :  { %v1916_v24 = vpop.permute.xlu1 %1089 }
0x15e5   :  { %1545 = vmatprep.mubr.msk.f32.mxu0 %vm135_vm4, %v1916_v24 }
0x15ed   :  { %v1695_v36 = vpop.eup %1694 }
0x15ee   :  { %1054 = vrot.lane.b32.xlu0 %v1695_v36, %s1732_s1 }
0x1660   :  { %v1055_v38 = vpop.permute.xlu0 %1054 }
0x1661   :  { %v1057_v39 = vmul.f32 %v1055_v38, %v1052_v35 }
0x1663   :  { %v1061_v7 = vadd.f32 %v1060_v19, %v1057_v39 }
0x1665   :  { %v1070_v26 = vsel %vm1066_vm7, %v1069_v8, %v1061_v7 }
0x1666   :  { %1091 = vrot.lane.b32.xlu0 %v1070_v26, %s1732_s1 }
0x16d8   :  { %v1092_v40 = vpop.permute.xlu0 %1091 }
0x16d9   :  { %1546 = vmatmul.mubr.msk.f32.vlgmr.msra.gmra.mrb[10].mxu0 %vm135_vm4, %v1092_v40 }
0x17ac   :  { %v1547_v48 = vpop.f32.mrb[10].mxu0 }
0x17ad   :  { %v1169_v49 = vadd.f32 %v1547_v48, %v1359_v47  ;;  %v1163_v50 = vpop.f32.mrb[11].mxu0 }
0x17ae   :  { %v1164_v51 = vadd.f32 %v1359_v47, %v1163_v50 }
0x17b0   :  { %1696 = vtanh.f32 %v1164_v51 }
0x17b1   :  { %1698 = vtanh.f32 %v1169_v49 }
0x17ba   :  { %v1697_v52 = vpop.eup %1696 }
0x17bb   :  { %v1699_v53 = vpop.eup %1698  ;;  %1556 = vmatprep.mubr.msk.f32.mxu1 %vm135_vm4, %v1697_v52 }
0x17bc   :  { %1557 = vmatmul.mubr.msk.f32.vlgmr.msra.gmra.mrb[10].mxu1 %vm135_vm4, %v1699_v53 }
0x188f   :  { %v1558_v56 = vpop.f32.mrb[10].mxu1 }
0x1890   :  { %v1256_v58 = vadd.f32 %v1558_v56, %v1362_v55  ;;  %v1250_v59 = vpop.f32.mrb[11].mxu1 }
0x1891   :  { %v1251_v60 = vadd.f32 %v1362_v55, %v1250_v59 }
0x1892   :  { %v1264_v61 = vmul.f32 %v1365_v57, %v1256_v58 }
0x1893   :  { %v1263_v62 = vmul.f32 %v1365_v57, %v1251_v60 }
0x1894   :  { %v1268_v63 = vsel %vm135_vm4, %v1264_v61, 0.0 }
0x1895   :  { %1269 = vadd.xlane.f32.xlu0 %v1268_v63  ;;  %v1265_v0 = vsel %vm135_vm4, %v1263_v62, 0.0 }
0x1896   :  { %1266 = vadd.xlane.f32.xlu1 %v1265_v0 }
0x18a7   :  { %1303 = vrot.lane.b32.xlu1 %v1788_v27, %s1733_s27 }
0x18ab   :  { %1301 = vrot.lane.b32.xlu0 %v1790_v28, %s1733_s27  ;;  %1309 = vrot.lane.b32.xlu1 %v1251_v60, %s1731_s0 }
0x18af   :  { %1311 = vrot.lane.b32.xlu0 %v1256_v58, %s1731_s0 }
0x1922   :  { %v1270_v1 = vpop.xlane.xlu0 %1269 }
0x1923   :  { %v1267_v3 = vpop.xlane.xlu1 %1266  ;;  %v1272_v10 = vmul.f32 %v1270_v1, %v1070_v26 }
0x1924   :  { %v1271_v37 = vmul.f32 %v1267_v3, %v1864_v2 }
0x1925   :  { %v1285_v20 = vrot.slane %v1272_v10, 2  ;;  %v1288_v23 = vrot.slane %v1272_v10, 4  ;;  %v1291_v25 = vrot.slane %v1272_v10, 6 }
0x1926   :  { %v1274_v4 = vrot.slane %v1271_v37, 2  ;;  %v1302_v5 = vpop.permute.xlu0 %1301  ;;  %v1277_v9 = vrot.slane %v1271_v37, 4  ;;  %v1280_v27 = vrot.slane %v1271_v37, 6 }
0x1927   :  { %v1304_v6 = vpop.permute.xlu1 %1303  ;;  %v1315_v13 = vsel %vm135_vm4, %v1916_v24, %v1302_v5 }
0x1928   :  { %v1276_v8 = vadd.f32 %v1274_v4, %v1271_v37  ;;  %v1316_v28 = vsel %vm135_vm4, %v1092_v40, %v1304_v6 }
0x192a   :  { %v1279_v11 = vadd.f32 %v1277_v9, %v1276_v8  ;;  %v1312_v12 = vpop.permute.xlu0 %1311 }
0x192b   :  { %v1319_v14 = vsel %vm1317_vm8, %v1316_v28, %v1312_v12  ;;  %v1310_v15 = vpop.permute.xlu1 %1309 }
0x192c   :  { %v1282_v16 = vadd.f32 %v1280_v27, %v1279_v11  ;;  %v1322_v2 = vsel %vm1320_vm9, %v1319_v14, 0.0  ;;  %v1318_v17 = vsel %vm1317_vm8, %v1315_v13, %v1310_v15 }
0x192d   :  { %1329 = vst [vmem:[%s1949_s2 + $0x8] sm:$0xff] %v1322_v2  ;;  %v1321_v18 = vsel %vm1320_vm9, %v1318_v17, 0.0 }
0x192e   :  { %1328 = vst [vmem:[%s1949_s2] sm:$0xff] %v1321_v18  ;;  %v1283_v21 = vadd.f32 %v1282_v16, %v1272_v10 }
0x1930   :  { %v1287_v29 = vadd.f32 %v1285_v20, %v1283_v21 }
0x1932   :  { %v1290_v24 = vadd.f32 %v1288_v23, %v1287_v29 }
0x1934   :  { %v1293_v31 = vadd.f32 %v1291_v25, %v1290_v24 }
0x1936   :  { %v1298_v32 = vadd.f32 %v1296_v30, %v1293_v31 }
0x1938   :  { %1324 = vrot.lane.b32.xlu1 %v1298_v32, %s1732_s1 }
0x19aa   :  { %v1325_v33 = vpop.permute.xlu1 %1324 }
0x19ab   :  { %v1327_v34 = vsel %vm135_vm4, %v1325_v33, 0.0 }
0x19ac   :  { %1330 = vst [vmem:[%s1949_s2 + $0x10] sm:$0x3] %v1327_v34 }
0x19ad   :  { %1335 = vsyncpa [#allocation3], 1 }

</bundles_post_ra>
